<compile_context>
chip_gen: v6e
topology: v6e:2x2x1
jax: 0.10.0
libtpu: 0.0.40
codegen_flags: <defaults>
</compile_context>

<pallas_src>
import functools

import jax
import jax.numpy as jnp
from jax.experimental import pallas as pl
from jax.experimental.pallas import tpu as pltpu

_BN_EPS = 1e-5
_PI_EPS = 1e-6
_EXP_CLAMP = 40.0       # exp(40)^2 ~ 5.5e34: E[h^2] and its batch sums stay finite in f32
_FUSED_MAX_ROWS = 2048  # single-block path cap; fits comfortably in the default scoped VMEM


# ----------------------------------------------------------------------------
# small helpers
# ----------------------------------------------------------------------------
def _round_up(n, m):
    return ((n + m - 1) // m) * m


def _pad2(a, rows, cols, dtype):
    a = jnp.asarray(a)
    out = jnp.zeros((rows, cols), dtype)
    return out.at[:a.shape[0], :a.shape[1]].set(a.astype(dtype))


def _pad1(v, n):
    v = jnp.asarray(v, jnp.float32).reshape(-1)
    return jnp.zeros((n,), jnp.float32).at[:v.shape[0]].set(v)


def _vmem_spec():
    return pl.BlockSpec(memory_space=pltpu.MemorySpace.VMEM)


# ----------------------------------------------------------------------------
# fused single-block kernel (small / medium batch: overhead-bound regime)
# ----------------------------------------------------------------------------
def _fused_kernel(x_ref, w1_ref, wp_ref, w2_ref, w3_ref, p_ref, o_ref, *, true_batch):
    f32 = jnp.float32
    bp = x_ref.shape[0]
    hp = w1_ref.shape[1]
    op = o_ref.shape[1]

    if true_batch == bp:
        def stats(h):
            return (jnp.mean(h, axis=0, keepdims=True),
                    jnp.mean(h * h, axis=0, keepdims=True))
    else:
        inv_b = f32(1.0 / true_batch)
        row_ids = jax.lax.broadcasted_iota(jnp.int32, (bp, 1), 0)
        mask = (row_ids < true_batch).astype(f32)

        def stats(h):
            hm = h * mask
            return (jnp.sum(hm, axis=0, keepdims=True) * inv_b,
                    jnp.sum(hm * h, axis=0, keepdims=True) * inv_b)

    def batchnorm(h, gamma, beta):
        # fused affine: h*scale + shift (2 VPU ops / element)
        mu, ms = stats(h)
        var = jnp.maximum(ms - mu * mu, 0.0)
        scale = gamma * jax.lax.rsqrt(var + f32(_BN_EPS))
        shift = beta - mu * scale
        return h * scale + shift

    def pvec(k, width):
        # row k of the packed (9, P) parameter array, as a (1, width) vector
        return p_ref[k:k + 1, :width]

    x = x_ref[...]                                      # already bf16 (wrapper)

    # Linear(I,H) + ReLU  (bf16 operands, f32 MXU accumulation)
    h = jnp.dot(x, w1_ref[...], preferred_element_type=f32) + pvec(0, hp)
    h = jnp.maximum(h, f32(0.0))
    h = batchnorm(h, pvec(1, hp), pvec(2, hp))

    # LogPiLayer(H,H): product-of-powers in log space, y = exp(W @ log(|x|+eps)).
    # TODO(synk): LogPiLayer source was not provided; this is the canonical
    # log-space Pi-layer (no bias).  Matmul kept in f32 for log-domain accuracy.
    logh = jnp.log(jnp.abs(h) + f32(_PI_EPS))
    z = jnp.dot(logh, wp_ref[...], preferred_element_type=f32)
    h = jnp.exp(jnp.minimum(z, f32(_EXP_CLAMP)))
    h = batchnorm(h, pvec(3, hp), pvec(4, hp))

    # Linear(H,H) + ReLU
    h = jnp.dot(h.astype(jnp.bfloat16), w2_ref[...],
                preferred_element_type=f32) + pvec(5, hp)
    h = jnp.maximum(h, f32(0.0))
    h = batchnorm(h, pvec(6, hp), pvec(7, hp))

    # Linear(H,O)  — lane-dense output block
    o_ref[...] = (jnp.dot(h.astype(jnp.bfloat16), w3_ref[...],
                          preferred_element_type=f32) + pvec(8, op)).astype(o_ref.dtype)


def _sps_forward_fused(x, params, dims, out_dtype):
    (w1, b1, g1, be1, wp, g2, be2, w2, b2, g3, be3, w3, b3) = params
    batch, _num_inputs, _hidden, num_outputs, ip, hp, op = dims

    bp = _round_up(batch, 8)
    pw = max(hp, op)

    x_p = _pad2(x, bp, ip, jnp.bfloat16)           # bf16 input: halves the x DMA
    w1_p = _pad2(w1, ip, hp, jnp.bfloat16)
    wp_p = _pad2(wp, hp, hp, jnp.float32)          # LogPi matmul stays f32
    w2_p = _pad2(w2, hp, hp, jnp.bfloat16)
    w3_p = _pad2(w3, hp, op, jnp.bfloat16)

    # pack the nine tiny per-feature vectors into one (9, P) f32 array (1 DMA)
    pvecs = jnp.zeros((9, pw), jnp.float32)
    for i, v in enumerate((b1, g1, be1, g2, be2, b2, g3, be3, b3)):
        flat = jnp.asarray(v, jnp.float32).reshape(-1)
        pvecs = pvecs.at[i, :flat.shape[0]].set(flat)

    flops = 2 * bp * (ip * hp + 2 * hp * hp + hp * op)
    transcendentals = 3 * bp * hp
    bytes_accessed = (x_p.size * 2
                      + (w1_p.size + w2_p.size + w3_p.size) * 2
                      + wp_p.size * 4 + pvecs.size * 4
                      + bp * op * jnp.dtype(out_dtype).itemsize)

    kernel = functools.partial(_fused_kernel, true_batch=batch)
    operands = (x_p, w1_p, wp_p, w2_p, w3_p, pvecs)

    out_padded = pl.pallas_call(
        kernel,
        out_shape=jax.ShapeDtypeStruct((bp, op), out_dtype),
        in_specs=[_vmem_spec() for _ in operands],
        out_specs=_vmem_spec(),
        cost_estimate=pl.CostEstimate(flops=flops,
                                      transcendentals=transcendentals,
                                      bytes_accessed=bytes_accessed),
    )(*operands)
    return out_padded[:batch, :num_outputs]


# ----------------------------------------------------------------------------
# batch-gridded staged path (large batch: pipelined, no VMEM ceiling, both
# v7x TensorCores via "parallel" batch tiles)
# ----------------------------------------------------------------------------
def _stage_kernel(x_ref, w_ref, aux_ref, y_ref, stats_ref, *,
                  true_batch, tile_rows, pre_affine, log_pi, relu, want_stats):
    """One network stage on one batch tile.

    aux rows: 0 = bias, 1 = BN scale, 2 = BN shift (all padded widths).
    """
    f32 = jnp.float32
    k = w_ref.shape[0]
    n = w_ref.shape[1]

    h = x_ref[...]
    if pre_affine:                                   # BN affine feeding LogPi
        h = h.astype(f32) * aux_ref[1:2, :k] + aux_ref[2:3, :k]

    if log_pi:
        logh = jnp.log(jnp.abs(h.astype(f32)) + f32(_PI_EPS))
        z = jnp.dot(logh, w_ref[...], preferred_element_type=f32)   # f32 matmul
        act = jnp.exp(jnp.minimum(z, f32(_EXP_CLAMP)))
    else:
        act = (jnp.dot(h.astype(w_ref.dtype), w_ref[...],
                       preferred_element_type=f32) + aux_ref[0:1, :n])
        if relu:
            act = jnp.maximum(act, f32(0.0))

    y_ref[...] = act.astype(y_ref.dtype)

    if want_stats:
        # Batch sums on the MXU (frees VPU/XLU); padded-row masking and the 1/B
        # normalisation are folded into the mask row for free.
        base = pl.program_id(0) * tile_rows
        rows = jax.lax.broadcasted_iota(jnp.int32, (8, tile_rows), 0)
        cols = jax.lax.broadcasted_iota(jnp.int32, (8, tile_rows), 1)
        valid = (rows == 0) & ((cols + base) < true_batch)
        mrow = jnp.where(valid, f32(1.0 / true_batch), f32(0.0))
        s1 = jnp.dot(mrow, act, preferred_element_type=f32)          # (8, n)
        s2 = jnp.dot(mrow, act * act, preferred_element_type=f32)    # (8, n)
        stats_ref[0:1, :] = s1[0:1, :]     # row 0: sum(h)/B
        stats_ref[1:2, :] = s2[0:1, :]     # row 1: sum(h^2)/B   (rows 2..7 unused)


def _sps_forward_staged(x, params, dims, batch_block, out_dtype):
    (w1, b1, g1, be1, wp, g2, be2, w2, b2, g3, be3, w3, b3) = params
    batch, _num_inputs, _hidden, num_outputs, ip, hp, op = dims

    tb = max(8, _round_up(batch_block, 8))
    bp = _round_up(batch, tb)
    nt = bp // tb
    pw = max(hp, op)

    x_p = _pad2(x, bp, ip, jnp.bfloat16)
    w1_p = _pad2(w1, ip, hp, jnp.bfloat16)
    wp_p = _pad2(wp, hp, hp, jnp.float32)
    w2_p = _pad2(w2, hp, hp, jnp.bfloat16)
    w3_p = _pad2(w3, hp, op, jnp.bfloat16)

    def pack_aux(bias=None, scale=None, shift=None):
        a = jnp.zeros((8, pw), jnp.float32)
        if bias is not None:
            a = a.at[0, :bias.shape[0]].set(bias)
        if scale is not None:
            a = a.at[1, :scale.shape[0]].set(scale)
        if shift is not None:
            a = a.at[2, :shift.shape[0]].set(shift)
        return a

    def run_stage(h_in, w, aux, *, pre_affine, log_pi, relu, want_stats, out_dt):
        k, n = w.shape
        kernel = functools.partial(
            _stage_kernel, true_batch=batch, tile_rows=tb,
            pre_affine=pre_affine, log_pi=log_pi, relu=relu, want_stats=want_stats)
        grid_spec = pltpu.PrefetchScalarGridSpec(
            num_scalar_prefetch=0, grid=(nt,),
            in_specs=[pl.BlockSpec((tb, k), lambda i: (i, 0)),    # batch tile
                      pl.BlockSpec((k, n), lambda i: (0, 0)),     # full weights
                      pl.BlockSpec((8, pw), lambda i: (0, 0))],   # packed vectors
            out_specs=[pl.BlockSpec((tb, n), lambda i: (i, 0)),
                       pl.BlockSpec((8, n), lambda i: (i, 0))])   # per-tile partial stats
        # Per-tile VMEM footprint is small, so the default scoped-VMEM limit is
        # plenty; "parallel" lets v7x's two TensorCores split the batch tiles.
        y, st = pl.pallas_call(
            kernel,
            out_shape=(jax.ShapeDtypeStruct((bp, n), out_dt),
                       jax.ShapeDtypeStruct((nt * 8, n), jnp.float32)),
            grid_spec=grid_spec,
            compiler_params=pltpu.CompilerParams(
                dimension_semantics=("parallel",)),
        )(h_in, w, aux)
        return y, st

    def bn_fold(st, gamma, beta, width):
        # partial sums already carry the 1/B weight -> just add tiles up.
        part = st.reshape(nt, 8, width)
        mu = jnp.sum(part[:, 0, :], axis=0)
        ms = jnp.sum(part[:, 1, :], axis=0)
        var = jnp.maximum(ms - mu * mu, 0.0)
        scale = _pad1(gamma, width) * jax.lax.rsqrt(var + _BN_EPS)
        shift = _pad1(beta, width) - mu * scale
        return scale, shift

    # Stage 1: h1 = relu(x @ W1 + b1)        (kept f32 for the log domain)
    h1, st1 = run_stage(x_p, w1_p, pack_aux(bias=_pad1(b1, hp)),
                        pre_affine=False, log_pi=False, relu=True,
                        want_stats=True, out_dt=jnp.float32)
    s1, t1 = bn_fold(st1, g1, be1, hp)

    # Stage 2: BN1 affine -> LogPi (f32 log / matmul / clamped exp)
    h2, st2 = run_stage(h1, wp_p, pack_aux(scale=s1, shift=t1),
                        pre_affine=True, log_pi=True, relu=False,
                        want_stats=True, out_dt=jnp.bfloat16)
    s2, t2 = bn_fold(st2, g2, be2, hp)

    # BN2 folded into W2 (wrapper side, O(H^2)): (h*s+t)@W2 + b2 = h@(s*W2) + (t@W2 + b2)
    w2_f = (s2[:, None] * w2_p.astype(jnp.float32)).astype(jnp.bfloat16)
    b2_f = t2 @ w2_p.astype(jnp.float32) + _pad1(b2, hp)
    h3, st3 = run_stage(h2, w2_f, pack_aux(bias=b2_f),
                        pre_affine=False, log_pi=False, relu=True,
                        want_stats=True, out_dt=jnp.bfloat16)
    s3, t3 = bn_fold(st3, g3, be3, hp)

    # BN3 folded into W3
    w3_f = (s3[:, None] * w3_p.astype(jnp.float32)).astype(jnp.bfloat16)
    b3_f = t3 @ w3_p.astype(jnp.float32) + _pad1(b3, op)
    out, _ = run_stage(h3, w3_f, pack_aux(bias=b3_f),
                       pre_affine=False, log_pi=False, relu=False,
                       want_stats=False, out_dt=out_dtype)

    return out[:batch, :num_outputs]


# ----------------------------------------------------------------------------
# public entry point
# ----------------------------------------------------------------------------
def sps_forward(x, params, *, batch_block=None, out_dtype=jnp.float32):
    """SPSApproximator forward.  `batch_block=None` auto-selects the path."""
    w1 = params[0]
    w3 = params[11]
    batch, num_inputs = x.shape
    hidden = w1.shape[1]
    num_outputs = w3.shape[1]

    ip = _round_up(num_inputs, 128)
    # v6e/v7x MXU is 2x256^2: round genuinely large hidden dims to 256; keep
    # 128 padding for small ones (no useless zero work).
    hp = _round_up(hidden, 128) if hidden <= 128 else _round_up(hidden, 256)
    op = _round_up(num_outputs, 128)
    dims = (batch, num_inputs, hidden, num_outputs, ip, hp, op)

    if batch_block is None:
        if _round_up(batch, 8) <= _FUSED_MAX_ROWS:
            return _sps_forward_fused(x, params, dims, out_dtype)
        batch_block = 512
    return _sps_forward_staged(x, params, dims, batch_block, out_dtype)


# ----------------------------------------------------------------------------
# parameters, pure-JAX reference, checks
# ----------------------------------------------------------------------------
def init_params(key, num_inputs, num_outputs, hidden_size):
    """Mirror the PyTorch module: Kaiming-normal Linear weights, zero biases,
    BatchNorm gamma=1 / beta=0.  Weights stored as (in_features, out_features).
    TODO(synk): LogPiLayer init not given in the provided source; small normal."""
    k1, k2, k3, kp = jax.random.split(key, 4)

    def kaiming(k, fan_in, fan_out):
        std = (2.0 / fan_in) ** 0.5
        return jax.random.normal(k, (fan_in, fan_out), jnp.float32) * std

    w1 = kaiming(k1, num_inputs, hidden_size)
    b1 = jnp.zeros((1, hidden_size), jnp.float32)
    w2 = kaiming(k2, hidden_size, hidden_size)
    b2 = jnp.zeros((1, hidden_size), jnp.float32)
    w3 = kaiming(k3, hidden_size, num_outputs)
    b3 = jnp.zeros((1, num_outputs), jnp.float32)
    wp = jax.random.normal(kp, (hidden_size, hidden_size), jnp.float32) * 0.05

    g1 = jnp.ones((1, hidden_size), jnp.float32)
    be1 = jnp.zeros((1, hidden_size), jnp.float32)
    g2 = jnp.ones((1, hidden_size), jnp.float32)
    be2 = jnp.zeros((1, hidden_size), jnp.float32)
    g3 = jnp.ones((1, hidden_size), jnp.float32)
    be3 = jnp.zeros((1, hidden_size), jnp.float32)

    return (w1, b1, g1, be1, wp, g2, be2, w2, b2, g3, be3, w3, b3)


def sps_reference(x, params):
    """Pure-JAX f32 reference (PyTorch training-mode BatchNorm semantics)."""
    (w1, b1, g1, be1, wp, g2, be2, w2, b2, g3, be3, w3, b3) = params

    def bn(h, g, b):
        mu = jnp.mean(h, axis=0, keepdims=True)
        var = jnp.mean((h - mu) ** 2, axis=0, keepdims=True)
        return (h - mu) * jax.lax.rsqrt(var + _BN_EPS) * g + b

    h = jnp.maximum(x @ w1 + b1, 0.0)
    h = bn(h, g1, be1)
    h = jnp.exp(jnp.log(jnp.abs(h) + _PI_EPS) @ wp)
    h = bn(h, g2, be2)
    h = jnp.maximum(h @ w2 + b2, 0.0)
    h = bn(h, g3, be3)
    return h @ w3 + b3


def _check(out, ref, expected_shape):
    assert out.shape == expected_shape
    assert bool(jnp.all(jnp.isfinite(out)))
    # bf16 operands + the log/exp Pi-layer amplify tiny rounding near ReLU zero
    # crossings, so use a robust (median) agreement check: it catches systematic
    # bugs (wrong fold / transpose / stats) while ignoring chaotic outliers.
    err = jnp.abs(out.astype(jnp.float32) - ref)
    scale = jnp.maximum(jnp.std(ref), jnp.float32(1.0))
    assert float(jnp.median(err)) < 0.1 * float(scale)


if __name__ == "__main__":
    num_inputs, num_outputs, hidden_size = 16, 4, 32
    key = jax.random.PRNGKey(0)
    k_p, k_small, k_big = jax.random.split(key, 3)
    params = init_params(k_p, num_inputs, num_outputs, hidden_size)

    # 1) tiny batch -> fused single-block kernel (overhead-bound regime)
    x_small = jax.random.normal(k_small, (8, num_inputs), jnp.float32)
    out_small = jax.block_until_ready(sps_forward(x_small, params))
    _check(out_small, sps_reference(x_small, params), (8, num_outputs))

    # 2) larger, non-tile-multiple batch -> staged, batch-gridded path
    x_big = jax.random.normal(k_big, (1000, num_inputs), jnp.float32)
    out_big = jax.block_until_ready(sps_forward(x_big, params, batch_block=256))
    _check(out_big, sps_reference(x_big, params), (1000, num_outputs))

    print("KERNEL_OK")
</pallas_src>

<mosaic_0001>
module attributes {stable_mosaic.version = 11 : i64} {
  func.func @_fused_kernel(%arg0: memref<8x128xbf16, #tpu.memory_space<vmem>>, %arg1: memref<128x128xbf16, #tpu.memory_space<vmem>>, %arg2: memref<128x128xf32, #tpu.memory_space<vmem>>, %arg3: memref<128x128xbf16, #tpu.memory_space<vmem>>, %arg4: memref<128x128xbf16, #tpu.memory_space<vmem>>, %arg5: memref<9x128xf32, #tpu.memory_space<vmem>>, %arg6: memref<8x128xf32, #tpu.memory_space<vmem>>) attributes {dimension_semantics = [], scalar_prefetch = 0 : i64, scratch_operands = 0 : i64, tpu.core_type = #tpu.core_type<tc>} {
    %c0 = arith.constant 0 : index
    %c0_0 = arith.constant 0 : index
    %0 = vector.load %arg0[%c0, %c0_0] : memref<8x128xbf16, #tpu.memory_space<vmem>>, vector<8x128xbf16>
    %c0_1 = arith.constant 0 : index
    %c0_2 = arith.constant 0 : index
    %1 = vector.load %arg1[%c0_1, %c0_2] : memref<128x128xbf16, #tpu.memory_space<vmem>>, vector<128x128xbf16>
    %cst = arith.constant dense<0.000000e+00> : vector<8x128xf32>
    %2 = tpu.matmul %0, %1, %cst {dimension_numbers = #tpu.dot_dimension_numbers<[1], [0], [0], [1], [0, 0, 1, 1], [], []>} : vector<8x128xbf16>, vector<128x128xbf16>, vector<8x128xf32> -> vector<8x128xf32>
    %c0_3 = arith.constant 0 : index
    %c0_4 = arith.constant 0 : index
    %3 = vector.load %arg5[%c0_3, %c0_4] : memref<9x128xf32, #tpu.memory_space<vmem>>, vector<1x128xf32>
    %4 = vector.broadcast %3 : vector<1x128xf32> to vector<8x128xf32>
    %5 = arith.addf %2, %4 : vector<8x128xf32>
    %cst_5 = arith.constant 0.000000e+00 : f32
    %6 = vector.broadcast %cst_5 : f32 to vector<8x128xf32>
    %7 = arith.maximumf %5, %6 : vector<8x128xf32>
    %c1 = arith.constant 1 : index
    %c0_6 = arith.constant 0 : index
    %8 = vector.load %arg5[%c1, %c0_6] : memref<9x128xf32, #tpu.memory_space<vmem>>, vector<1x128xf32>
    %c2 = arith.constant 2 : index
    %c0_7 = arith.constant 0 : index
    %9 = vector.load %arg5[%c2, %c0_7] : memref<9x128xf32, #tpu.memory_space<vmem>>, vector<1x128xf32>
    %cst_8 = arith.constant dense<0.000000e+00> : vector<128xf32>
    %10 = vector.multi_reduction <add>, %7, %cst_8 [0] : vector<8x128xf32> to vector<128xf32>
    %11 = vector.shape_cast %10 : vector<128xf32> to vector<1x128xf32>
    %cst_9 = arith.constant 8.000000e+00 : f32
    %12 = vector.broadcast %cst_9 : f32 to vector<1x128xf32>
    %13 = arith.divf %11, %12 : vector<1x128xf32>
    %14 = arith.mulf %7, %7 : vector<8x128xf32>
    %cst_10 = arith.constant dense<0.000000e+00> : vector<128xf32>
    %15 = vector.multi_reduction <add>, %14, %cst_10 [0] : vector<8x128xf32> to vector<128xf32>
    %16 = vector.shape_cast %15 : vector<128xf32> to vector<1x128xf32>
    %cst_11 = arith.constant 8.000000e+00 : f32
    %17 = vector.broadcast %cst_11 : f32 to vector<1x128xf32>
    %18 = arith.divf %16, %17 : vector<1x128xf32>
    %19 = arith.mulf %13, %13 : vector<1x128xf32>
    %20 = arith.subf %18, %19 : vector<1x128xf32>
    %cst_12 = arith.constant 0.000000e+00 : f32
    %21 = vector.broadcast %cst_12 : f32 to vector<1x128xf32>
    %22 = arith.maximumf %20, %21 : vector<1x128xf32>
    %cst_13 = arith.constant 9.99999974E-6 : f32
    %23 = vector.broadcast %cst_13 : f32 to vector<1x128xf32>
    %24 = arith.addf %22, %23 : vector<1x128xf32>
    %25 = math.rsqrt %24 : vector<1x128xf32>
    %26 = arith.mulf %8, %25 : vector<1x128xf32>
    %27 = arith.mulf %13, %26 : vector<1x128xf32>
    %28 = arith.subf %9, %27 : vector<1x128xf32>
    %29 = vector.broadcast %26 : vector<1x128xf32> to vector<8x128xf32>
    %30 = arith.mulf %7, %29 : vector<8x128xf32>
    %31 = vector.broadcast %28 : vector<1x128xf32> to vector<8x128xf32>
    %32 = arith.addf %30, %31 : vector<8x128xf32>
    %33 = math.absf %32 : vector<8x128xf32>
    %cst_14 = arith.constant 9.99999997E-7 : f32
    %34 = vector.broadcast %cst_14 : f32 to vector<8x128xf32>
    %35 = arith.addf %33, %34 : vector<8x128xf32>
    %36 = math.log %35 : vector<8x128xf32>
    %c0_15 = arith.constant 0 : index
    %c0_16 = arith.constant 0 : index
    %37 = vector.load %arg2[%c0_15, %c0_16] : memref<128x128xf32, #tpu.memory_space<vmem>>, vector<128x128xf32>
    %cst_17 = arith.constant dense<0.000000e+00> : vector<8x128xf32>
    %38 = tpu.matmul %36, %37, %cst_17 {dimension_numbers = #tpu.dot_dimension_numbers<[1], [0], [0], [1], [0, 0, 1, 1], [], []>} : vector<8x128xf32>, vector<128x128xf32>, vector<8x128xf32> -> vector<8x128xf32>
    %cst_18 = arith.constant 4.000000e+01 : f32
    %39 = vector.broadcast %cst_18 : f32 to vector<8x128xf32>
    %40 = arith.minimumf %38, %39 : vector<8x128xf32>
    %41 = math.exp %40 : vector<8x128xf32>
    %c3 = arith.constant 3 : index
    %c0_19 = arith.constant 0 : index
    %42 = vector.load %arg5[%c3, %c0_19] : memref<9x128xf32, #tpu.memory_space<vmem>>, vector<1x128xf32>
    %c4 = arith.constant 4 : index
    %c0_20 = arith.constant 0 : index
    %43 = vector.load %arg5[%c4, %c0_20] : memref<9x128xf32, #tpu.memory_space<vmem>>, vector<1x128xf32>
    %cst_21 = arith.constant dense<0.000000e+00> : vector<128xf32>
    %44 = vector.multi_reduction <add>, %41, %cst_21 [0] : vector<8x128xf32> to vector<128xf32>
    %45 = vector.shape_cast %44 : vector<128xf32> to vector<1x128xf32>
    %cst_22 = arith.constant 8.000000e+00 : f32
    %46 = vector.broadcast %cst_22 : f32 to vector<1x128xf32>
    %47 = arith.divf %45, %46 : vector<1x128xf32>
    %48 = arith.mulf %41, %41 : vector<8x128xf32>
    %cst_23 = arith.constant dense<0.000000e+00> : vector<128xf32>
    %49 = vector.multi_reduction <add>, %48, %cst_23 [0] : vector<8x128xf32> to vector<128xf32>
    %50 = vector.shape_cast %49 : vector<128xf32> to vector<1x128xf32>
    %cst_24 = arith.constant 8.000000e+00 : f32
    %51 = vector.broadcast %cst_24 : f32 to vector<1x128xf32>
    %52 = arith.divf %50, %51 : vector<1x128xf32>
    %53 = arith.mulf %47, %47 : vector<1x128xf32>
    %54 = arith.subf %52, %53 : vector<1x128xf32>
    %cst_25 = arith.constant 0.000000e+00 : f32
    %55 = vector.broadcast %cst_25 : f32 to vector<1x128xf32>
    %56 = arith.maximumf %54, %55 : vector<1x128xf32>
    %cst_26 = arith.constant 9.99999974E-6 : f32
    %57 = vector.broadcast %cst_26 : f32 to vector<1x128xf32>
    %58 = arith.addf %56, %57 : vector<1x128xf32>
    %59 = math.rsqrt %58 : vector<1x128xf32>
    %60 = arith.mulf %42, %59 : vector<1x128xf32>
    %61 = arith.mulf %47, %60 : vector<1x128xf32>
    %62 = arith.subf %43, %61 : vector<1x128xf32>
    %63 = vector.broadcast %60 : vector<1x128xf32> to vector<8x128xf32>
    %64 = arith.mulf %41, %63 : vector<8x128xf32>
    %65 = vector.broadcast %62 : vector<1x128xf32> to vector<8x128xf32>
    %66 = arith.addf %64, %65 : vector<8x128xf32>
    %67 = arith.truncf %66 : vector<8x128xf32> to vector<8x128xbf16>
    %c0_27 = arith.constant 0 : index
    %c0_28 = arith.constant 0 : index
    %68 = vector.load %arg3[%c0_27, %c0_28] : memref<128x128xbf16, #tpu.memory_space<vmem>>, vector<128x128xbf16>
    %cst_29 = arith.constant dense<0.000000e+00> : vector<8x128xf32>
    %69 = tpu.matmul %67, %68, %cst_29 {dimension_numbers = #tpu.dot_dimension_numbers<[1], [0], [0], [1], [0, 0, 1, 1], [], []>} : vector<8x128xbf16>, vector<128x128xbf16>, vector<8x128xf32> -> vector<8x128xf32>
    %c5 = arith.constant 5 : index
    %c0_30 = arith.constant 0 : index
    %70 = vector.load %arg5[%c5, %c0_30] : memref<9x128xf32, #tpu.memory_space<vmem>>, vector<1x128xf32>
    %71 = vector.broadcast %70 : vector<1x128xf32> to vector<8x128xf32>
    %72 = arith.addf %69, %71 : vector<8x128xf32>
    %cst_31 = arith.constant 0.000000e+00 : f32
    %73 = vector.broadcast %cst_31 : f32 to vector<8x128xf32>
    %74 = arith.maximumf %72, %73 : vector<8x128xf32>
    %c6 = arith.constant 6 : index
    %c0_32 = arith.constant 0 : index
    %75 = vector.load %arg5[%c6, %c0_32] : memref<9x128xf32, #tpu.memory_space<vmem>>, vector<1x128xf32>
    %c7 = arith.constant 7 : index
    %c0_33 = arith.constant 0 : index
    %76 = vector.load %arg5[%c7, %c0_33] : memref<9x128xf32, #tpu.memory_space<vmem>>, vector<1x128xf32>
    %cst_34 = arith.constant dense<0.000000e+00> : vector<128xf32>
    %77 = vector.multi_reduction <add>, %74, %cst_34 [0] : vector<8x128xf32> to vector<128xf32>
    %78 = vector.shape_cast %77 : vector<128xf32> to vector<1x128xf32>
    %cst_35 = arith.constant 8.000000e+00 : f32
    %79 = vector.broadcast %cst_35 : f32 to vector<1x128xf32>
    %80 = arith.divf %78, %79 : vector<1x128xf32>
    %81 = arith.mulf %74, %74 : vector<8x128xf32>
    %cst_36 = arith.constant dense<0.000000e+00> : vector<128xf32>
    %82 = vector.multi_reduction <add>, %81, %cst_36 [0] : vector<8x128xf32> to vector<128xf32>
    %83 = vector.shape_cast %82 : vector<128xf32> to vector<1x128xf32>
    %cst_37 = arith.constant 8.000000e+00 : f32
    %84 = vector.broadcast %cst_37 : f32 to vector<1x128xf32>
    %85 = arith.divf %83, %84 : vector<1x128xf32>
    %86 = arith.mulf %80, %80 : vector<1x128xf32>
    %87 = arith.subf %85, %86 : vector<1x128xf32>
    %cst_38 = arith.constant 0.000000e+00 : f32
    %88 = vector.broadcast %cst_38 : f32 to vector<1x128xf32>
    %89 = arith.maximumf %87, %88 : vector<1x128xf32>
    %cst_39 = arith.constant 9.99999974E-6 : f32
    %90 = vector.broadcast %cst_39 : f32 to vector<1x128xf32>
    %91 = arith.addf %89, %90 : vector<1x128xf32>
    %92 = math.rsqrt %91 : vector<1x128xf32>
    %93 = arith.mulf %75, %92 : vector<1x128xf32>
    %94 = arith.mulf %80, %93 : vector<1x128xf32>
    %95 = arith.subf %76, %94 : vector<1x128xf32>
    %96 = vector.broadcast %93 : vector<1x128xf32> to vector<8x128xf32>
    %97 = arith.mulf %74, %96 : vector<8x128xf32>
    %98 = vector.broadcast %95 : vector<1x128xf32> to vector<8x128xf32>
    %99 = arith.addf %97, %98 : vector<8x128xf32>
    %100 = arith.truncf %99 : vector<8x128xf32> to vector<8x128xbf16>
    %c0_40 = arith.constant 0 : index
    %c0_41 = arith.constant 0 : index
    %101 = vector.load %arg4[%c0_40, %c0_41] : memref<128x128xbf16, #tpu.memory_space<vmem>>, vector<128x128xbf16>
    %cst_42 = arith.constant dense<0.000000e+00> : vector<8x128xf32>
    %102 = tpu.matmul %100, %101, %cst_42 {dimension_numbers = #tpu.dot_dimension_numbers<[1], [0], [0], [1], [0, 0, 1, 1], [], []>} : vector<8x128xbf16>, vector<128x128xbf16>, vector<8x128xf32> -> vector<8x128xf32>
    %c8 = arith.constant 8 : index
    %c0_43 = arith.constant 0 : index
    %103 = vector.load %arg5[%c8, %c0_43] : memref<9x128xf32, #tpu.memory_space<vmem>>, vector<1x128xf32>
    %104 = vector.broadcast %103 : vector<1x128xf32> to vector<8x128xf32>
    %105 = arith.addf %102, %104 : vector<8x128xf32>
    %c0_44 = arith.constant 0 : index
    %c0_45 = arith.constant 0 : index
    %106 = vector.load %arg6[%c0_44, %c0_45] : memref<8x128xf32, #tpu.memory_space<vmem>>, vector<8x128xf32>
    tpu.vector_store %arg6[%c0_44, %c0_45], %105 {strides = array<i32>} : memref<8x128xf32, #tpu.memory_space<vmem>>, vector<8x128xf32>,
    return
  }
}

</mosaic_0001>

<bundles_post_ra>
// kernel: tpu_custom_call.1
= control target key start
LH: loop header
LB: loop body
LE: loop exit
PB: predicated region body
PF: predicated region fallthrough
CT: control target
= control target key end

     0   :  { %11 = vsyncpa [#allocation3], 0  ;;  %s1152_s0 = inlined_call_operand.hbm [shape: bf16[8,128], index: 0, kind: input, shape index: {}]   ;;  %s1153_s1 = inlined_call_operand.hbm [shape: bf16[128,128], index: 1, kind: input, shape index: {}]   ;;  %s1154_s2 = inlined_call_operand.hbm [shape: f32[128,128], index: 2, kind: input, shape index: {}]   ;;  %s1155_s3 = inlined_call_operand.hbm [shape: bf16[128,128], index: 3, kind: input, shape index: {}]   ;;  %s1156_s4 = inlined_call_operand.hbm [shape: bf16[128,128], index: 4, kind: input, shape index: {}]   ;;  %s1157_s5 = inlined_call_operand.hbm [shape: f32[9,128], index: 5, kind: input, shape index: {}]   ;;  %s1158_s6 = inlined_call_operand.hbm [shape: f32[8,128], index: 6, kind: output, shape index: {}]  }
   0x1   :  { %12 = vsyncpa [#allocation6], 0 }
   0x2   :  { %13 = vsyncpa [#allocation9], 0 }
   0x3   :  { %14 = vsyncpa [#allocation12], 0 }
   0x4   :  { %15 = vsyncpa [#allocation4], 0  ;;  %s1018_s21 = smov [#allocation5]  }
   0x5   :  { %s31_s22 = sshll.u32 %s1018_s21, 4  ;;  %s32_s22 = int_to_ptr.vmem [resolvable:$true] %s31_s22 }
   0x6   :  { %s876_s23 = scalar_lea.vmem %s32_s22, 1024  ;;  %p881_p1 = scmp.lt.s32.totalorder %s32_s22, %s32_s22 }
   0x7   :  { %p877_p0 = scmp.ne.s32.totalorder %s32_s22, %s876_s23  ;;  %p882_p2 = scmp.lt.s32.totalorder %s876_s23, %s876_s23 }
   0x9   :  { %p883_p3 = por %p882_p2, %p881_p1 }
   0xb   :  { %p884_p4 = pnand %p883_p3, %p877_p0 }
   0xd   :  { %887 = shalt.err (!%p884_p4)
}
   0xe   :  { %s1019_s24 = smov 64   ;;  %s1020_s25 = smov 4  }
   0xf   :  { %37 = dma.hbm_to_vmem [thread:$0]  %s1153_s1, 1024, %s32_s22, [#allocation6], %s1019_s24, %s1019_s24, %s1020_s25  }
  0x10   :  { %s1021_s28 = smov [#allocation8]   ;;  %s1022_s30 = smov [#allocation2]  }
  0x11   :  { %s55_s29 = sshll.u32 %s1021_s28, 4  ;;  %s22_s7 = sshll.u32 %s1022_s30, 4  ;;  %s56_s29 = int_to_ptr.vmem [resolvable:$true] %s55_s29  ;;  %s23_s7 = int_to_ptr.vmem [resolvable:$true] %s22_s7 }
  0x12   :  { %s896_s8 = scalar_lea.vmem %s56_s29, 1024  ;;  %p901_p6 = scmp.lt.s32.totalorder %s56_s29, %s56_s29 }
  0x13   :  { %p897_p5 = scmp.ne.s32.totalorder %s56_s29, %s896_s8  ;;  %p902_p7 = scmp.lt.s32.totalorder %s896_s8, %s896_s8 }
  0x15   :  { %p903_p8 = por %p902_p7, %p901_p6 }
  0x17   :  { %p904_p9 = pnand %p903_p8, %p897_p5 }
  0x19   :  { %907 = shalt.err (!%p904_p9)
}
  0x1a   :  { %61 = dma.hbm_to_vmem [thread:$0]  %s1155_s3, 1024, %s56_s29, [#allocation9], %s1019_s24, %s1019_s24, %s1020_s25  }
  0x1b   :  { %s916_s1 = scalar_lea.vmem %s23_s7, 64  ;;  %p921_p11 = scmp.lt.s32.totalorder %s23_s7, %s23_s7 }
  0x1c   :  { %p917_p10 = scmp.ne.s32.totalorder %s23_s7, %s916_s1  ;;  %p922_p12 = scmp.lt.s32.totalorder %s916_s1, %s916_s1 }
  0x1e   :  { %p923_p13 = por %p922_p12, %p921_p11 }
  0x20   :  { %p924_p0 = pnand %p923_p13, %p917_p10 }
  0x22   :  { %927 = shalt.err (!%p924_p0)
}
  0x23   :  { %25 = dma.hbm_to_vmem [thread:$0]  %s1152_s0, 64, %s23_s7, [#allocation3]  }
  0x24   :  { %s1023_s13 = smov [#allocation7]  }
  0x25   :  { %s43_s14 = sshll.u32 %s1023_s13, 4  ;;  %s44_s14 = int_to_ptr.vmem [resolvable:$true] %s43_s14 }
  0x26   :  { %s936_s15 = scalar_lea.vmem %s44_s14, 2048  ;;  %p941_p2 = scmp.lt.s32.totalorder %s44_s14, %s44_s14 }
  0x27   :  { %p937_p1 = scmp.ne.s32.totalorder %s44_s14, %s936_s15  ;;  %p942_p3 = scmp.lt.s32.totalorder %s936_s15, %s936_s15 }
  0x29   :  { %p943_p4 = por %p942_p3, %p941_p2 }
  0x2b   :  { %p944_p5 = pnand %p943_p4, %p937_p1 }
  0x2d   :  { %947 = shalt.err (!%p944_p5)
}
  0x2e   :  { %s1024_s3 = smov 128   ;;  %s1025_s16 = smov 8  }
  0x2f   :  { %49 = dma.hbm_to_vmem [thread:$0]  %s1154_s2, 2048, %s44_s14, [#allocation6], %s1024_s3, %s1024_s3, %s1025_s16  }
  0x30   :  { %s1026_s19 = smov [#allocation10]   ;;  %s1027_s21 = smov [#allocation11]  }
  0x31   :  { %s67_s20 = sshll.u32 %s1026_s19, 4  ;;  %s79_s0 = sshll.u32 %s1027_s21, 4  ;;  %s68_s20 = int_to_ptr.vmem [resolvable:$true] %s67_s20  ;;  %s80_s0 = int_to_ptr.vmem [resolvable:$true] %s79_s0 }
  0x32   :  { %s956_s22 = scalar_lea.vmem %s68_s20, 1024  ;;  %p961_p7 = scmp.lt.s32.totalorder %s68_s20, %s68_s20 }
  0x33   :  { %p957_p6 = scmp.ne.s32.totalorder %s68_s20, %s956_s22  ;;  %p962_p8 = scmp.lt.s32.totalorder %s956_s22, %s956_s22 }
  0x35   :  { %p963_p9 = por %p962_p8, %p961_p7 }
  0x37   :  { %p964_p10 = pnand %p963_p9, %p957_p6 }
  0x39   :  { %967 = shalt.err (!%p964_p10)
}
  0x3a   :  { %73 = dma.hbm_to_vmem [thread:$0]  %s1156_s4, 1024, %s68_s20, [#allocation9], %s1019_s24, %s1019_s24, %s1020_s25  }
  0x3b   :  { %s976_s2 = scalar_lea.vmem %s80_s0, 256  ;;  %p981_p12 = scmp.lt.s32.totalorder %s80_s0, %s80_s0 }
  0x3c   :  { %p977_p11 = scmp.ne.s32.totalorder %s80_s0, %s976_s2  ;;  %p982_p13 = scmp.lt.s32.totalorder %s976_s2, %s976_s2 }
  0x3e   :  { %p983_p0 = por %p982_p13, %p981_p12 }
  0x40   :  { %p984_p1 = pnand %p983_p0, %p977_p11 }
  0x42   :  { %987 = shalt.err (!%p984_p1)
}
  0x43   :  { %85 = dma.hbm_to_vmem [thread:$0]  %s1157_s5, 256, %s80_s0, [#allocation12], %s1024_s3, %s1024_s3, %s1025_s16  }
  0x44   :  { %1008 = dma.done.wait [#allocation3], 64  }
  0x45   :  { %1009 = vsyncadd [#allocation3], 4294967232 }
  0x46   :  { %1010 = dma.done.wait [#allocation6], 3072  }
  0x47   :  { %1011 = vsyncadd [#allocation6], 4294964224 }
  0x48   :  { %1012 = dma.done.wait [#allocation9], 2048  }
  0x49   :  { %1013 = vsyncadd [#allocation9], 4294965248 }
  0x4a   :  { %1014 = dma.done.wait [#allocation12], 256  }
  0x4b   :  { %1015 = vsyncadd [#allocation12], 4294967040  ;;  %v1028_v0 = vmov 0.0   ;;  %vm1029_vm0 = vmmov 0   ;;  %v834_v1 = vld [vmem:[#allocation5 + $0x38] sm:$0xff]   ;;  %v835_v2 = vld [vmem:[#allocation5 + $0x30] sm:$0xff]   ;;  %v242_v52 = vlaneseq }
  0x4c   :  { %726 = vmatprep.subr.bf16.mxu0 %v1028_v0  ;;  %742 = vmatprep.mubr.msk.bf16.mxu0 %vm1029_vm0, %v1028_v0  ;;  %v836_v3 = vld [vmem:[#allocation5 + $0x28] sm:$0xff]   ;;  %v837_v4 = vld [vmem:[#allocation5 + $0x20] sm:$0xff]   ;;  %v838_v5 = vld [vmem:[#allocation5 + $0x18] sm:$0xff]   ;;  %s1030_s4 = smov [#allocation13]  }
  0x4d   :  { %746 = vmatprep.subr.mxu1 %v1028_v0  ;;  %778 = vmatprep.mubr.msk.f32.mxu1 %vm1029_vm0, %v1028_v0  ;;  %v839_v6 = vld [vmem:[#allocation5 + $0x10] sm:$0xff]   ;;  %v840_v7 = vld [vmem:[#allocation5 + $0x8] sm:$0xff]   ;;  %v841_v8 = vld [vmem:[#allocation5] sm:$0xff]   ;;  %v243_v53 = vshrl.u32 %v242_v52, 7  ;;  %s643_s5 = sshll.u32 %s1030_s4, 4  ;;  %s644_s5 = int_to_ptr.vmem [resolvable:$true] %s643_s5 }
  0x4e   :  { %727 = vmatpush3.bf16.msra.mxu0 %v834_v1  ;;  %v105_v9 = vld [vmem:[#allocation2] sm:$0xf]  ;;  %v270_v11 = vld [vmem:[#allocation7 + $0x70] sm:$0xff]  ;;  %v269_v12 = vld [vmem:[#allocation7 + $0x68] sm:$0xff]  ;;  %s988_s24 = scalar_lea.vmem %s644_s5, 128  ;;  %p993_p3 = scmp.lt.s32.totalorder %s644_s5, %s644_s5 }
  0x4f   :  { %728 = vmatprep.subr.bf16.mxu0 %v1028_v0  ;;  %v271_v10 = vld [vmem:[#allocation7 + $0x78] sm:$0xff]  ;;  %v268_v13 = vld [vmem:[#allocation7 + $0x60] sm:$0xff]  ;;  %v266_v15 = vld [vmem:[#allocation7 + $0x50] sm:$0xff]  ;;  %v1125_v55 = vsub.s32 0, %v243_v53  ;;  %p989_p2 = scmp.ne.s32.totalorder %s644_s5, %s988_s24  ;;  %p994_p4 = scmp.lt.s32.totalorder %s988_s24, %s988_s24 }
  0x50   :  { %747 = vmatpush3.msra.mxu1 %v271_v10  ;;  %v267_v14 = vld [vmem:[#allocation7 + $0x58] sm:$0xff]  ;;  %v265_v16 = vld [vmem:[#allocation7 + $0x48] sm:$0xff]  ;;  %v264_v17 = vld [vmem:[#allocation7 + $0x40] sm:$0xff] }
  0x51   :  { %748 = vmatprep.subr.mxu1 %v1028_v0  ;;  %v263_v18 = vld [vmem:[#allocation7 + $0x38] sm:$0xff]  ;;  %v262_v19 = vld [vmem:[#allocation7 + $0x30] sm:$0xff]  ;;  %v261_v20 = vld [vmem:[#allocation7 + $0x28] sm:$0xff]  ;;  %p995_p5 = por %p994_p4, %p993_p3 }
  0x52   :  { %729 = vmatpush3.bf16.msra.mxu0 %v835_v2  ;;  %749 = vmatpush3.msra.mxu1 %v270_v11  ;;  %v260_v21 = vld [vmem:[#allocation7 + $0x20] sm:$0xff]  ;;  %v259_v22 = vld [vmem:[#allocation7 + $0x18] sm:$0xff]  ;;  %v258_v23 = vld [vmem:[#allocation7 + $0x10] sm:$0xff] }
  0x53   :  { %730 = vmatprep.subr.bf16.mxu0 %v1028_v0  ;;  %750 = vmatprep.subr.mxu1 %v1028_v0  ;;  %v257_v24 = vld [vmem:[#allocation7 + $0x8] sm:$0xff]  ;;  %v256_v25 = vld [vmem:[#allocation7] sm:$0xff]  ;;  %v846_v10 = vld [vmem:[#allocation8 + $0x18] sm:$0xff]   ;;  %p996_p6 = pnand %p995_p5, %p989_p2 }
  0x54   :  { %751 = vmatpush3.msra.mxu1 %v269_v12  ;;  %v655_v26 = vld [vmem:[#allocation11] ss:$0 sm:$0xff]  ;;  %v216_v54 = vld [vmem:[#allocation11 + $0x1] sm:$0x1]  ;;  %v217_v58 = vld [vmem:[#allocation11 + $0x2] sm:$0x1] }
  0x55   :  { %752 = vmatprep.subr.mxu1 %v1028_v0  ;;  %v847_v11 = vld [vmem:[#allocation8 + $0x10] sm:$0xff]   ;;  %v848_v12 = vld [vmem:[#allocation8 + $0x8] sm:$0xff]   ;;  %v853_v52 = vld [vmem:[#allocation10 + $0x20] sm:$0xff]  }
  0x56   :  { %731 = vmatpush3.bf16.msra.mxu0 %v836_v3  ;;  %753 = vmatpush3.msra.mxu1 %v268_v13  ;;  %v849_v13 = vld [vmem:[#allocation8] sm:$0xff]   ;;  %v854_v53 = vld [vmem:[#allocation10 + $0x18] sm:$0xff]  }
  0x57   :  { %732 = vmatprep.subr.bf16.mxu0 %v1028_v0  ;;  %754 = vmatprep.subr.mxu1 %v1028_v0 }
  0x58   :  { %755 = vmatpush3.msra.mxu1 %v267_v14 }
  0x59   :  { %756 = vmatprep.subr.mxu1 %v1028_v0 }
  0x5a   :  { %733 = vmatpush3.bf16.msra.mxu0 %v837_v4  ;;  %757 = vmatpush3.msra.mxu1 %v266_v15 }
  0x5b   :  { %734 = vmatprep.subr.bf16.mxu0 %v1028_v0  ;;  %758 = vmatprep.subr.mxu1 %v1028_v0 }
  0x5c   :  { %759 = vmatpush3.msra.mxu1 %v265_v16 }
  0x5d   :  { %760 = vmatprep.subr.mxu1 %v1028_v0 }
  0x5e   :  { %735 = vmatpush3.bf16.msra.mxu0 %v838_v5  ;;  %761 = vmatpush3.msra.mxu1 %v264_v17 }
  0x5f   :  { %736 = vmatprep.subr.bf16.mxu0 %v1028_v0  ;;  %762 = vmatprep.subr.mxu1 %v1028_v0 }
  0x60   :  { %763 = vmatpush3.msra.mxu1 %v263_v18 }
  0x61   :  { %764 = vmatprep.subr.mxu1 %v1028_v0 }
  0x62   :  { %737 = vmatpush3.bf16.msra.mxu0 %v839_v6  ;;  %765 = vmatpush3.msra.mxu1 %v262_v19  ;;  %v842_v6 = vld [vmem:[#allocation8 + $0x38] sm:$0xff]  }
  0x63   :  { %738 = vmatprep.subr.bf16.mxu0 %v1028_v0  ;;  %766 = vmatprep.subr.mxu1 %v1028_v0 }
  0x64   :  { %767 = vmatpush3.msra.mxu1 %v261_v20 }
  0x65   :  { %768 = vmatprep.subr.mxu1 %v1028_v0 }
  0x66   :  { %739 = vmatpush3.bf16.msra.mxu0 %v840_v7  ;;  %769 = vmatpush3.msra.mxu1 %v260_v21  ;;  %v843_v7 = vld [vmem:[#allocation8 + $0x30] sm:$0xff]  }
  0x67   :  { %740 = vmatprep.subr.bf16.mxu0 %v1028_v0  ;;  %770 = vmatprep.subr.mxu1 %v1028_v0 }
  0x68   :  { %771 = vmatpush3.msra.mxu1 %v259_v22 }
  0x69   :  { %772 = vmatprep.subr.mxu1 %v1028_v0 }
  0x6a   :  { %741 = vmatpush3.bf16.msra.mxu0 %v841_v8  ;;  %773 = vmatpush3.msra.mxu1 %v258_v23  ;;  %v844_v8 = vld [vmem:[#allocation8 + $0x28] sm:$0xff]  }
  0x6b   :  { %781 = vmatprep.subr.bf16.mxu0 %v1028_v0  ;;  %774 = vmatprep.subr.mxu1 %v1028_v0 }
  0x6c   :  { %775 = vmatpush3.msra.mxu1 %v257_v24 }
  0x6d   :  { %743 = vmatmul.mubr.bf16.vlgmr.msra.gmra.mxu0 %v105_v9  ;;  %776 = vmatprep.subr.mxu1 %v1028_v0  ;;  %v845_v9 = vld [vmem:[#allocation8 + $0x20] sm:$0xff]  }
  0x6e   :  { %797 = vmatprep.mubr.msk.bf16.mxu0 %vm1029_vm0, %v1028_v0  ;;  %777 = vmatpush3.msra.mxu1 %v256_v25 }
  0x6f   :  { %801 = vmatprep.subr.bf16.mxu1 %v1028_v0  ;;  %782 = vmatpush3.bf16.msra.mxu0 %v842_v6 }
  0x70   :  { %783 = vmatprep.subr.bf16.mxu0 %v1028_v0 }
  0x73   :  { %784 = vmatpush3.bf16.msra.mxu0 %v843_v7 }
  0x74   :  { %785 = vmatprep.subr.bf16.mxu0 %v1028_v0 }
  0x77   :  { %786 = vmatpush3.bf16.msra.mxu0 %v844_v8 }
  0x78   :  { %787 = vmatprep.subr.bf16.mxu0 %v1028_v0 }
  0x7b   :  { %788 = vmatpush3.bf16.msra.mxu0 %v845_v9 }
  0x7c   :  { %789 = vmatprep.subr.bf16.mxu0 %v1028_v0 }
  0x7f   :  { %790 = vmatpush3.bf16.msra.mxu0 %v846_v10 }
  0x80   :  { %791 = vmatprep.subr.bf16.mxu0 %v1028_v0 }
  0x83   :  { %792 = vmatpush3.bf16.msra.mxu0 %v847_v11 }
  0x84   :  { %793 = vmatprep.subr.bf16.mxu0 %v1028_v0 }
  0x87   :  { %794 = vmatpush3.bf16.msra.mxu0 %v848_v12 }
  0x88   :  { %795 = vmatprep.subr.bf16.mxu0 %v1028_v0 }
  0x8b   :  { %796 = vmatpush3.bf16.msra.mxu0 %v849_v13 }
 0x12d   :  { %v209_v27 = vpop.f32.mrf.mxu0 }
 0x12e   :  { %v210_v28 = vadd.f32 %v655_v26, %v209_v27 }
 0x12f   :  { %v744_v29 = vpop.f32.mrf.mxu0 }
 0x130   :  { %v215_v30 = vmax.f32 %v210_v28, 0.0 }
 0x131   :  { %v212_v31 = vpop.f32.mrf.mxu0 }
 0x132   :  { %v218_v32 = vrot.slane %v215_v30, 4  ;;  %v226_v33 = vmul.f32 %v215_v30, %v215_v30 }
 0x133   :  { %v745_v34 = vpop.f32.mrf.mxu0 }
 0x134   :  { %v219_v35 = vadd.f32 %v218_v32, %v215_v30  ;;  %v227_v36 = vrot.slane %v226_v33, 4 }
 0x136   :  { %v220_v37 = vrot.slane %v219_v35, 2  ;;  %v228_v38 = vadd.f32 %v227_v36, %v226_v33 }
 0x138   :  { %v221_v39 = vadd.f32 %v220_v37, %v219_v35  ;;  %v229_v40 = vrot.slane %v228_v38, 2 }
 0x13a   :  { %v222_v41 = vrot.slane %v221_v39, 1  ;;  %v230_v42 = vadd.f32 %v229_v40, %v228_v38  ;;  %v345_v38 = vld [vmem:[#allocation11 + $0x3] sm:$0x1] }
 0x13c   :  { %v223_v43 = vadd.f32 %v222_v41, %v221_v39  ;;  %v231_v44 = vrot.slane %v230_v42, 1  ;;  %v346_v41 = vld [vmem:[#allocation11 + $0x4] sm:$0x1] }
 0x13e   :  { %v225_v45 = vmul.f32 0.125, %v223_v43  ;;  %v232_v46 = vadd.f32 %v231_v44, %v230_v42 }
 0x140   :  { %v233_v47 = vmul.f32 0.125, %v232_v46  ;;  %v234_v48 = vmul.f32 %v225_v45, %v225_v45 }
 0x142   :  { %v235_v49 = vsub.f32 %v233_v47, %v234_v48 }
 0x144   :  { %v236_v50 = vmax.f32 %v235_v49, 0.0  ;;  %v850_v49 = vld [vmem:[#allocation10 + $0x38] sm:$0xff]  }
 0x146   :  { %v237_v51 = vadd.f32 1e-05, %v236_v50  ;;  %v851_v50 = vld [vmem:[#allocation10 + $0x30] sm:$0xff]  }
 0x148   :  { %858 = vrsqrt.f32 %v237_v51  ;;  %v852_v51 = vld [vmem:[#allocation10 + $0x28] sm:$0xff]  }
 0x155   :  { %v859_v56 = vpop.eup %858 }
 0x156   :  { %v239_v57 = vmul.f32 %v859_v56, %v216_v54  ;;  %v855_v54 = vld [vmem:[#allocation10 + $0x10] sm:$0xff]   ;;  %v856_v56 = vld [vmem:[#allocation10 + $0x8] sm:$0xff]  }
 0x158   :  { %v245_v59 = vrot.slane %v239_v57, %v1125_v55  ;;  %v240_v60 = vmul.f32 %v239_v57, %v225_v45  ;;  %v857_v57 = vld [vmem:[#allocation10] sm:$0xff]  }
 0x15a   :  { %v241_v61 = vsub.f32 %v217_v58, %v240_v60  ;;  %v246_v62 = vmul.f32 %v245_v59, %v215_v30  ;;  %v664_v58 = vld [vmem:[#allocation11 + $0x5] ss:$0 sm:$0xff] }
 0x15c   :  { %v250_v63 = vrot.slane %v241_v61, %v1125_v55 }
 0x15e   :  { %v251_v1 = vadd.f32 %v250_v63, %v246_v62 }
 0x160   :  { %v252_v2 = vand.u32 2147483647, %v251_v1 }
 0x162   :  { %v253_v3 = vadd.f32 1e-06, %v252_v2 }
 0x164   :  { %860 = vlog2.f32 %v253_v3 }
 0x171   :  { %v861_v4 = vpop.eup %860 }
 0x172   :  { %v255_v5 = vmul.f32 0.6931472, %v861_v4 }
 0x174   :  { %779 = vmatmul.mubr.f32.vlgmr.msra.gmra.mxu1 %v255_v5 }
 0x175   :  { %817 = vmatprep.mubr.msk.bf16.mxu1 %vm1029_vm0, %v1028_v0  ;;  %802 = vmatpush3.bf16.msra.mxu1 %v850_v49 }
 0x176   :  { %803 = vmatprep.subr.bf16.mxu1 %v1028_v0 }
 0x179   :  { %804 = vmatpush3.bf16.msra.mxu1 %v851_v50 }
 0x17a   :  { %805 = vmatprep.subr.bf16.mxu1 %v1028_v0 }
 0x17d   :  { %806 = vmatpush3.bf16.msra.mxu1 %v852_v51 }
 0x17e   :  { %807 = vmatprep.subr.bf16.mxu1 %v1028_v0 }
 0x181   :  { %808 = vmatpush3.bf16.msra.mxu1 %v853_v52 }
 0x182   :  { %809 = vmatprep.subr.bf16.mxu1 %v1028_v0 }
 0x185   :  { %810 = vmatpush3.bf16.msra.mxu1 %v854_v53 }
 0x186   :  { %811 = vmatprep.subr.bf16.mxu1 %v1028_v0 }
 0x189   :  { %812 = vmatpush3.bf16.msra.mxu1 %v855_v54 }
 0x18a   :  { %813 = vmatprep.subr.bf16.mxu1 %v1028_v0 }
 0x18d   :  { %814 = vmatpush3.bf16.msra.mxu1 %v856_v56 }
 0x18e   :  { %815 = vmatprep.subr.bf16.mxu1 %v1028_v0 }
 0x191   :  { %816 = vmatpush3.bf16.msra.mxu1 %v857_v57 }
 0x234   :  { %v338_v14 = vpop.f32.mrf.mxu1 }
 0x235   :  { %v342_v15 = vmin.f32 %v338_v14, 40.0 }
 0x236   :  { %v780_v16 = vpop.f32.mrf.mxu1 }
 0x237   :  { %v343_v17 = vmul.f32 1.442695, %v342_v15 }
 0x239   :  { %862 = vpow2.f32 %v343_v17 }
 0x246   :  { %v863_v18 = vpop.eup %862 }
 0x247   :  { %v347_v19 = vrot.slane %v863_v18, 4  ;;  %v354_v20 = vmul.f32 %v863_v18, %v863_v18 }
 0x249   :  { %v348_v21 = vadd.f32 %v863_v18, %v347_v19  ;;  %v355_v22 = vrot.slane %v354_v20, 4 }
 0x24b   :  { %v349_v23 = vrot.slane %v348_v21, 2  ;;  %v356_v24 = vadd.f32 %v355_v22, %v354_v20  ;;  %v491_v20 = vld [vmem:[#allocation11 + $0x6] sm:$0x1] }
 0x24d   :  { %v350_v25 = vadd.f32 %v349_v23, %v348_v21  ;;  %v357_v26 = vrot.slane %v356_v24, 2  ;;  %v492_v23 = vld [vmem:[#allocation11 + $0x7] sm:$0x1] }
 0x24f   :  { %v351_v27 = vrot.slane %v350_v25, 1  ;;  %v358_v28 = vadd.f32 %v357_v26, %v356_v24 }
 0x251   :  { %v352_v29 = vadd.f32 %v351_v27, %v350_v25  ;;  %v359_v30 = vrot.slane %v358_v28, 1 }
 0x253   :  { %v353_v31 = vmul.f32 0.125, %v352_v29  ;;  %v360_v32 = vadd.f32 %v359_v30, %v358_v28 }
 0x255   :  { %v361_v33 = vmul.f32 0.125, %v360_v32  ;;  %v362_v34 = vmul.f32 %v353_v31, %v353_v31 }
 0x257   :  { %v363_v35 = vsub.f32 %v361_v33, %v362_v34 }
 0x259   :  { %v364_v36 = vmax.f32 %v363_v35, 0.0 }
 0x25b   :  { %v365_v37 = vadd.f32 1e-05, %v364_v36 }
 0x25d   :  { %864 = vrsqrt.f32 %v365_v37 }
 0x26a   :  { %v865_v39 = vpop.eup %864 }
 0x26b   :  { %v367_v40 = vmul.f32 %v865_v39, %v345_v38 }
 0x26d   :  { %v368_v42 = vmul.f32 %v367_v40, %v353_v31  ;;  %v373_v43 = vrot.slane %v367_v40, %v1125_v55  ;;  %v673_v31 = vld [vmem:[#allocation11 + $0x8] ss:$0 sm:$0xff] }
 0x26f   :  { %v369_v44 = vsub.f32 %v346_v41, %v368_v42  ;;  %v374_v45 = vmul.f32 %v863_v18, %v373_v43 }
 0x271   :  { %v378_v46 = vrot.slane %v369_v44, %v1125_v55 }
 0x273   :  { %v379_v47 = vadd.f32 %v378_v46, %v374_v45 }
 0x275   :  { %v380_v48 = vpack.c.bf16 %v379_v47, %v379_v47 }
 0x277   :  { %798 = vmatmul.mubr.bf16.vlgmr.msra.gmra.mxu0 %v380_v48 }
 0x337   :  { %v484_v59 = vpop.f32.mrf.mxu0 }
 0x338   :  { %v485_v60 = vadd.f32 %v664_v58, %v484_v59 }
 0x339   :  { %v799_v61 = vpop.f32.mrf.mxu0 }
 0x33a   :  { %v490_v62 = vmax.f32 %v485_v60, 0.0 }
 0x33b   :  { %v487_v63 = vpop.f32.mrf.mxu0 }
 0x33c   :  { %v493_v1 = vrot.slane %v490_v62, 4  ;;  %v500_v2 = vmul.f32 %v490_v62, %v490_v62 }
 0x33d   :  { %v800_v3 = vpop.f32.mrf.mxu0 }
 0x33e   :  { %v494_v4 = vadd.f32 %v493_v1, %v490_v62  ;;  %v501_v5 = vrot.slane %v500_v2, 4 }
 0x340   :  { %v495_v6 = vrot.slane %v494_v4, 2  ;;  %v502_v7 = vadd.f32 %v501_v5, %v500_v2 }
 0x342   :  { %v496_v8 = vadd.f32 %v495_v6, %v494_v4  ;;  %v503_v9 = vrot.slane %v502_v7, 2 }
 0x344   :  { %v497_v10 = vrot.slane %v496_v8, 1  ;;  %v504_v11 = vadd.f32 %v503_v9, %v502_v7 }
 0x346   :  { %v498_v12 = vadd.f32 %v497_v10, %v496_v8  ;;  %v505_v0 = vrot.slane %v504_v11, 1 }
 0x348   :  { %v499_v13 = vmul.f32 0.125, %v498_v12  ;;  %v506_v14 = vadd.f32 %v505_v0, %v504_v11 }
 0x34a   :  { %v507_v15 = vmul.f32 0.125, %v506_v14  ;;  %v508_v16 = vmul.f32 %v499_v13, %v499_v13 }
 0x34c   :  { %v509_v17 = vsub.f32 %v507_v15, %v508_v16 }
 0x34e   :  { %v510_v18 = vmax.f32 %v509_v17, 0.0 }
 0x350   :  { %v511_v19 = vadd.f32 1e-05, %v510_v18 }
 0x352   :  { %866 = vrsqrt.f32 %v511_v19 }
 0x35f   :  { %v867_v21 = vpop.eup %866 }
 0x360   :  { %v513_v22 = vmul.f32 %v867_v21, %v491_v20 }
 0x362   :  { %v519_v24 = vrot.slane %v513_v22, %v1125_v55  ;;  %v514_v25 = vmul.f32 %v513_v22, %v499_v13 }
 0x364   :  { %v515_v26 = vsub.f32 %v492_v23, %v514_v25  ;;  %v520_v27 = vmul.f32 %v519_v24, %v490_v62 }
 0x366   :  { %v524_v28 = vrot.slane %v515_v26, %v1125_v55 }
 0x368   :  { %v525_v29 = vadd.f32 %v524_v28, %v520_v27 }
 0x36a   :  { %v526_v30 = vpack.c.bf16 %v525_v29, %v525_v29 }
 0x36c   :  { %818 = vmatmul.mubr.bf16.vlgmr.msra.gmra.mxu1 %v526_v30 }
 0x42c   :  { %v630_v32 = vpop.f32.mrf.mxu1 }
 0x42d   :  { %v631_v33 = vadd.f32 %v673_v31, %v630_v32 }
 0x42e   :  { %v819_v34 = vpop.f32.mrf.mxu1 }
 0x42f   :  { %636 = vst [vmem:[#allocation13] sm:$0xff] %v631_v33 }
 0x430   :  { %v633_v35 = vpop.f32.mrf.mxu1 }
 0x431   :  { %999 = shalt.err (!%p996_p6)
}
 0x432   :  { %646 = dma.vmem_to_hbm [thread:$0]  %s644_s5, 128, %s1158_s6, [#allocation4]   ;;  %v820_v55 = vpop.f32.mrf.mxu1 }
 0x433   :  { %1016 = dma.done.wait [#allocation4], 128  }
 0x434   :  { %1017 = vsyncadd [#allocation4], 4294967168 }
 0x435   :  { %650 = vsyncpa [#allocation3], 1 }
 0x436   :  { %651 = vsyncpa [#allocation6], 1 }
 0x437   :  { %652 = vsyncpa [#allocation9], 1 }
 0x438   :  { %653 = vsyncpa [#allocation12], 1 }
 0x439   :  { %654 = vsyncpa [#allocation4], 1 }

</bundles_post_ra>
